<compile_context>
chip_gen: v7x
topology: tpu7x:2x2x1
jax: 0.10.0
libtpu: 0.0.40
codegen_flags: <defaults>
</compile_context>

<pallas_src>
import functools

import jax
import jax.numpy as jnp
from jax.experimental import pallas as pl
from jax.experimental.pallas import tpu as pltpu


def _default_vmem_limit():
    # Generation-aware scoped-VMEM ceiling: ~96 MiB on v5e/v6e (128 MiB physical VMEM),
    # ~48 MiB on v7x (64 MiB physical).  Conservative fallback if the query fails.
    try:
        info = pltpu.get_tpu_info()
        cap = getattr(info, "vmem_capacity_bytes", None)
        if cap:
            return min(96 * 1024 * 1024, (int(cap) * 3) // 4)
    except Exception:
        pass
    return 48 * 1024 * 1024


VMEM_LIMIT = _default_vmem_limit()


def _tile(dim, target, align):
    """Largest tile <= target that divides dim and respects (8,128) alignment, else full dim."""
    if dim <= target:
        return dim
    t = (target // align) * align
    while t > align and dim % t:
        t -= align
    return t if t > 0 and dim % t == 0 else dim


def _compiler_params(*semantics):
    return pltpu.CompilerParams(dimension_semantics=tuple(semantics),
                                vmem_limit_bytes=VMEM_LIMIT)


# ----------------------------- Pallas kernels -----------------------------

def _rmsnorm_matmul_kernel(x_ref, g_ref, w_ref, o_ref, xn_ref):
    # T5LayerNorm (no mean subtraction, eps=1e-6) fused into the consuming projection matmul.
    # The normalized/bf16-cast tile is computed once per m-tile (j==0) and cached in VMEM.
    @pl.when(pl.program_id(1) == 0)
    def _():
        x = x_ref[...]
        var = jnp.mean(x * x, axis=-1, keepdims=True)
        xn_ref[...] = (x * jax.lax.rsqrt(var + 1e-6) * g_ref[...]).astype(jnp.bfloat16)

    o_ref[...] = jnp.dot(xn_ref[...], w_ref[...],
                         preferred_element_type=jnp.float32).astype(o_ref.dtype)


def rmsnorm_matmul(x, g, w, *, tm=1024, tn=512):
    """rmsnorm(x) @ w.  x:(M,D) f32, g:(1,D) f32, w:(D,N) bf16 -> (M,N) bf16.
    Tiled over (M, N); K (=D) stays whole because the norm reduces over it.
    N is the (sequential) inner axis so the cached normalized tile is valid."""
    m, d = x.shape
    _, n = w.shape
    tm = _tile(m, tm, 8)
    tn = _tile(n, tn, 128)
    cost = pl.CostEstimate(flops=int(2 * m * d * n + 4 * m * d),
                           transcendentals=int(m),
                           bytes_accessed=int(4 * m * d + 2 * d * n + 2 * m * n))
    return pl.pallas_call(
        _rmsnorm_matmul_kernel,
        out_shape=jax.ShapeDtypeStruct((m, n), jnp.bfloat16),
        grid=(m // tm, n // tn),
        in_specs=[pl.BlockSpec((tm, d), lambda i, j: (i, 0)),
                  pl.BlockSpec((1, d), lambda i, j: (0, 0),
                               pipeline_mode=pl.Buffered(1)),
                  pl.BlockSpec((d, tn), lambda i, j: (0, j))],
        out_specs=pl.BlockSpec((tm, tn), lambda i, j: (i, j)),
        scratch_shapes=[pltpu.VMEM((tm, d), jnp.bfloat16)],
        compiler_params=_compiler_params("parallel", "arbitrary"),
        cost_estimate=cost,
    )(x, g, w)


def _rmsnorm_ffn_kernel(x_ref, g_ref, wi_ref, wo_ref, o_ref, acc_ref, xn_ref):
    # ln2 + DenseReluDense + residual, accumulated over d_ff tiles in an f32 VMEM scratch.
    # Norm + bf16 cast done once per m-tile; accumulator initialized with the residual.
    j = pl.program_id(1)

    @pl.when(j == 0)
    def _():
        x = x_ref[...]
        var = jnp.mean(x * x, axis=-1, keepdims=True)
        xn_ref[...] = (x * jax.lax.rsqrt(var + 1e-6) * g_ref[...]).astype(jnp.bfloat16)
        acc_ref[...] = x                      # fused residual

    h = jnp.dot(xn_ref[...], wi_ref[...], preferred_element_type=jnp.float32)
    h = jnp.maximum(h, 0.0).astype(jnp.bfloat16)
    acc_ref[...] += jnp.dot(h, wo_ref[...], preferred_element_type=jnp.float32)

    @pl.when(j == pl.num_programs(1) - 1)
    def _():
        o_ref[...] = acc_ref[...]


def rmsnorm_ffn(x, g, wi, wo, *, tm=1024, tf=512):
    """x + relu(rmsnorm(x) @ wi) @ wo.  x:(M,D) f32, wi:(D,F) bf16, wo:(F,D) bf16 -> (M,D) f32."""
    m, d = x.shape
    _, f = wi.shape
    tm = _tile(m, tm, 8)
    tf = _tile(f, tf, 128)
    cost = pl.CostEstimate(flops=int(4 * m * d * f + 5 * m * d),
                           transcendentals=int(m),
                           bytes_accessed=int(8 * m * d + 4 * d * f))
    return pl.pallas_call(
        _rmsnorm_ffn_kernel,
        out_shape=jax.ShapeDtypeStruct((m, d), jnp.float32),
        grid=(m // tm, f // tf),
        in_specs=[pl.BlockSpec((tm, d), lambda i, j: (i, 0)),
                  pl.BlockSpec((1, d), lambda i, j: (0, 0),
                               pipeline_mode=pl.Buffered(1)),
                  pl.BlockSpec((d, tf), lambda i, j: (0, j)),
                  pl.BlockSpec((tf, d), lambda i, j: (j, 0))],
        out_specs=pl.BlockSpec((tm, d), lambda i, j: (i, 0)),
        scratch_shapes=[pltpu.VMEM((tm, d), jnp.float32),
                        pltpu.VMEM((tm, d), jnp.bfloat16)],
        compiler_params=_compiler_params("parallel", "arbitrary"),
        cost_estimate=cost,
    )(x, g, wi, wo)


def _attention_kernel(q_ref, k_ref, v_ref, pos_ref, mask_ref, wo_ref, res_ref, o_ref):
    # One (batch, head) pair per grid step.  The output block index is constant across the head
    # axis, so o_ref stays resident in VMEM: init with residual at h==0, accumulate per head.
    h = pl.program_id(1)

    @pl.when(h == 0)
    def _():
        o_ref[...] = res_ref[...]

    q = q_ref[0, 0]                        # (S, dk) bf16
    k = k_ref[0, 0]                        # (S, dk) bf16
    v = v_ref[0, 0]                        # (S, dk) bf16
    # T5 attention: NO 1/sqrt(d_kv) scaling; contract last dims (no explicit K transpose).
    s = jax.lax.dot_general(q, k, (((1,), (1,)), ((), ())),
                            preferred_element_type=jnp.float32)           # (S, S) f32
    s = s + pos_ref[0] + mask_ref[0]       # (S,S) + (S,S) + (1,S) key-axis mask bias
    s = s - jnp.max(s, axis=-1, keepdims=True)
    p = jnp.exp(s)
    p = p * pl.reciprocal(jnp.sum(p, axis=-1, keepdims=True), approx=True)
    ctx = jnp.dot(p.astype(jnp.bfloat16), v, preferred_element_type=jnp.float32)  # (S, dk)
    # Fused per-head output projection + residual accumulation:
    #   concat_h(ctx_h) @ Wo == sum_h ctx_h @ Wo[h]
    proj = jnp.dot(ctx.astype(jnp.bfloat16), wo_ref[0],
                   preferred_element_type=jnp.float32)                    # (S, D)
    o_ref[0] = o_ref[0] + proj
    # TODO(synk): for long sequences (S >= 2048), tile the KV axis flash-style (online softmax)
    # instead of holding the full (S,S) score matrix; P@V already contracts over the full S.


def attention_block(q, k, v, pos_bias, mask_bias, wo, residual):
    """q/k/v:(B,H,S,dk) bf16, pos_bias:(H,S,S) f32, mask_bias:(B,1,S) f32, wo:(H*dk,D) bf16,
    residual:(B,S,D) f32 -> residual + attn @ wo, shape (B,S,D) f32."""
    b, n_heads, s, dk = q.shape
    d = residual.shape[-1]
    wo_h = wo.reshape(n_heads, dk, d)      # free reshape: per-head Wo slab, leading-axis indexed
    cost = pl.CostEstimate(
        flops=int(b * n_heads * (4 * s * s * dk + 2 * s * dk * d)),
        transcendentals=int(b * n_heads * s * s),
        bytes_accessed=int(6 * b * n_heads * s * dk + 4 * b * n_heads * s * s
                           + 4 * b * s + 2 * b * n_heads * dk * d + 8 * b * s * d))
    return pl.pallas_call(
        _attention_kernel,
        out_shape=jax.ShapeDtypeStruct((b, s, d), jnp.float32),
        grid=(b, n_heads),
        in_specs=[pl.BlockSpec((1, 1, s, dk), lambda i, h: (i, h, 0, 0)),
                  pl.BlockSpec((1, 1, s, dk), lambda i, h: (i, h, 0, 0)),
                  pl.BlockSpec((1, 1, s, dk), lambda i, h: (i, h, 0, 0)),
                  pl.BlockSpec((1, s, s), lambda i, h: (h, 0, 0)),       # bias streamed per head
                  pl.BlockSpec((1, 1, s), lambda i, h: (i, 0, 0)),
                  pl.BlockSpec((1, dk, d), lambda i, h: (h, 0, 0)),
                  pl.BlockSpec((1, s, d), lambda i, h: (i, 0, 0))],
        out_specs=pl.BlockSpec((1, s, d), lambda i, h: (i, 0, 0)),
        compiler_params=_compiler_params("parallel", "arbitrary"),
        cost_estimate=cost,
    )(q, k, v, pos_bias, mask_bias, wo_h, residual)


# ----------------------------- JAX glue -----------------------------

def relative_position_bucket(relative_position, num_buckets, max_distance):
    # HF T5, bidirectional=True.
    num_buckets = num_buckets // 2
    buckets = (relative_position > 0).astype(jnp.int32) * num_buckets
    n = jnp.abs(relative_position)
    max_exact = num_buckets // 2
    is_small = n < max_exact
    val_if_large = max_exact + (
        jnp.log(jnp.maximum(n, 1).astype(jnp.float32) / max_exact)
        / jnp.log(max_distance / max_exact)
        * (num_buckets - max_exact)
    ).astype(jnp.int32)
    val_if_large = jnp.minimum(val_if_large, num_buckets - 1)
    return buckets + jnp.where(is_small, n, val_if_large)


def codet5_classifier_forward(params, ids, mask, cfg):
    B, S = ids.shape
    D, H, Dk = cfg["d_model"], cfg["n_heads"], cfg["d_kv"]
    inner = H * Dk
    M = B * S

    # Token embedding lookup (glue, left to XLA).
    hidden = params["embed"][ids]                                     # (B, S, D) f32

    # Attention-mask additive bias, kept factored as (B, 1, S); broadcast happens in-kernel.
    mask_bias = ((1.0 - mask.astype(jnp.float32)) * -1e9).reshape(B, 1, S)

    # Shared relative-position bias (computed once, reused by every layer), factored as (H, S, S).
    ctx = jnp.arange(S)[:, None]
    mem = jnp.arange(S)[None, :]
    buckets = relative_position_bucket(mem - ctx, cfg["num_buckets"], cfg["max_distance"])
    pos_bias = jnp.transpose(params["rel_bias"][buckets], (2, 0, 1))   # (H, S, S) f32

    for layer in params["layers"]:
        # --- self-attention sub-block: ln1 + fused QKV proj (bf16 out) ---
        qkv = rmsnorm_matmul(hidden.reshape(M, D), layer["ln1"], layer["wqkv"])   # (M, 3*inner) bf16
        # Head-major re-layout in the wrapper so head selection in the kernel is a leading-axis
        # BlockSpec index (no 64-lane sub-vreg slicing inside the kernel).
        qkv = qkv.reshape(B, S, 3, H, Dk).transpose(2, 0, 3, 1, 4)                # (3, B, H, S, Dk)
        # attention + per-head Wo projection + residual, accumulated per head in-kernel
        hidden = attention_block(qkv[0], qkv[1], qkv[2], pos_bias, mask_bias,
                                 layer["wo_attn"], hidden)

        # --- feed-forward sub-block: ln2 + wi + ReLU + wo + residual, all fused ---
        hidden = rmsnorm_ffn(hidden.reshape(M, D), layer["ln2"],
                             layer["wi"], layer["wo_ff"]).reshape(B, S, D)

    # emb = encoder_output[:, -1] (literal last position, as in the torch module), then the final
    # encoder RMSNorm (per-row, so normalizing only the selected row is identical), dropout
    # (identity in eval), and the (D,2) classifier head.  Left to XLA: a 2-lane-wide Pallas
    # output forces masked stores and launch overhead exceeds the compute.
    emb = hidden[:, -1]                                                # (B, D)
    var = jnp.mean(emb * emb, axis=-1, keepdims=True)
    emb = emb * jax.lax.rsqrt(var + 1e-6) * params["final_ln"]
    # TODO(synk): dropout(p=0.25) omitted — the torch module applies it only in training mode.
    logits = jnp.dot(emb, params["out_w"]) + params["out_b"]           # (B, 2)
    return logits


def init_params(key, cfg):
    D, H, Dk, F = cfg["d_model"], cfg["n_heads"], cfg["d_kv"], cfg["d_ff"]
    inner = H * Dk
    n_layers = cfg["n_layers"]
    keys = jax.random.split(key, 3 + 4 * n_layers)
    ki = iter(range(len(keys)))

    def nrm(shape, scale=0.02, dtype=jnp.float32):
        return (scale * jax.random.normal(keys[next(ki)], shape)).astype(dtype)

    layers = []
    for _ in range(n_layers):
        layers.append(dict(
            ln1=jnp.ones((1, D), jnp.float32),
            # Q|K|V fused into one (D, 3*inner) weight (head-major within each of Q/K/V);
            # matmul weights stored bf16 (MXU operands, half the weight DMA); norm scales f32.
            wqkv=nrm((D, 3 * inner), dtype=jnp.bfloat16),
            wo_attn=nrm((inner, D), dtype=jnp.bfloat16),
            ln2=jnp.ones((1, D), jnp.float32),
            wi=nrm((D, F), dtype=jnp.bfloat16),
            wo_ff=nrm((F, D), dtype=jnp.bfloat16),
        ))
    return dict(
        embed=nrm((cfg["vocab"], D), scale=1.0),
        rel_bias=nrm((cfg["num_buckets"], H)),
        layers=layers,
        final_ln=jnp.ones((1, D), jnp.float32),
        out_w=nrm((D, 2)),
        out_b=jnp.zeros((1, 2), jnp.float32),
    )


if __name__ == "__main__":
    # Scaled-down codet5p-770m encoder config (real: d_model=1024, d_kv=64, heads=16, d_ff=4096,
    # 24 layers).  Tile defaults / VMEM budget are chosen for the real shapes; on this toy config
    # every block collapses to the full array.
    cfg = dict(vocab=128, d_model=32, d_kv=8, n_heads=4, d_ff=64, n_layers=2,
               num_buckets=32, max_distance=128)

    key = jax.random.PRNGKey(0)
    pkey, ikey = jax.random.split(key)
    params = init_params(pkey, cfg)

    B, S = 2, 8
    ids = jax.random.randint(ikey, (B, S), 0, cfg["vocab"], dtype=jnp.int32)
    mask = jnp.array([[1, 1, 1, 1, 1, 1, 1, 1],
                      [1, 1, 1, 1, 1, 1, 0, 0]], dtype=jnp.int32)

    fwd = jax.jit(functools.partial(codet5_classifier_forward, cfg=cfg))
    logits = fwd(params, ids, mask)
    jax.block_until_ready(logits)
    assert logits.shape == (B, 2) and logits.dtype == jnp.float32
    print("KERNEL_OK")
</pallas_src>

<mosaic_0001>
module attributes {stable_mosaic.version = 11 : i64} {
  func.func @_rmsnorm_matmul_kernel(%arg0: i32, %arg1: i32, %arg2: memref<16x32xf32, #tpu.memory_space<vmem>>, %arg3: memref<1x32xf32, #tpu.memory_space<vmem>>, %arg4: memref<32x96xbf16, #tpu.memory_space<vmem>>, %arg5: memref<16x96xbf16, #tpu.memory_space<vmem>>, %arg6: memref<16x32xbf16, #tpu.memory_space<vmem>>) attributes {dimension_semantics = [#tpu.dimension_semantics<parallel>, #tpu.dimension_semantics<arbitrary>], iteration_bounds = array<i64: 1, 1>, scalar_prefetch = 0 : i64, scratch_operands = 1 : i64, tpu.core_type = #tpu.core_type<tc>, window_params = [{transform_indices = @transform_0, window_bounds = array<i64: 16, 32>}, {pipeline_mode = #tpu.pipeline_mode<synchronous>, transform_indices = @transform_1, window_bounds = array<i64: 1, 32>}, {transform_indices = @transform_2, window_bounds = array<i64: 32, 96>}, {transform_indices = @transform_3, window_bounds = array<i64: 16, 96>}]} {
    %c0_i32 = arith.constant 0 : i32
    %0 = arith.cmpi eq, %arg1, %c0_i32 : i32
    %1 = arith.extui %0 : i1 to i32
    %c0_i32_0 = arith.constant 0 : i32
    %2 = arith.cmpi ne, %1, %c0_i32_0 : i32
    scf.if %2 {
      %c0_6 = arith.constant 0 : index
      %c0_7 = arith.constant 0 : index
      %8 = vector.load %arg2[%c0_6, %c0_7] : memref<16x32xf32, #tpu.memory_space<vmem>>, vector<16x32xf32>
      %9 = arith.mulf %8, %8 : vector<16x32xf32>
      %cst_8 = arith.constant dense<0.000000e+00> : vector<16xf32>
      %10 = vector.multi_reduction <add>, %9, %cst_8 [1] : vector<16x32xf32> to vector<16xf32>
      %11 = vector.shape_cast %10 : vector<16xf32> to vector<16x1xf32>
      %cst_9 = arith.constant 3.200000e+01 : f32
      %12 = vector.broadcast %cst_9 : f32 to vector<16x1xf32>
      %13 = arith.divf %11, %12 : vector<16x1xf32>
      %cst_10 = arith.constant 9.99999997E-7 : f32
      %14 = vector.broadcast %cst_10 : f32 to vector<16x1xf32>
      %15 = arith.addf %13, %14 : vector<16x1xf32>
      %16 = math.rsqrt %15 : vector<16x1xf32>
      %17 = vector.broadcast %16 : vector<16x1xf32> to vector<16x32xf32>
      %18 = arith.mulf %8, %17 : vector<16x32xf32>
      %c0_11 = arith.constant 0 : index
      %c0_12 = arith.constant 0 : index
      %19 = vector.load %arg3[%c0_11, %c0_12] : memref<1x32xf32, #tpu.memory_space<vmem>>, vector<1x32xf32>
      %20 = vector.broadcast %19 : vector<1x32xf32> to vector<16x32xf32>
      %21 = arith.mulf %18, %20 : vector<16x32xf32>
      %22 = arith.truncf %21 : vector<16x32xf32> to vector<16x32xbf16>
      %c0_13 = arith.constant 0 : index
      %c0_14 = arith.constant 0 : index
      %23 = vector.load %arg6[%c0_13, %c0_14] : memref<16x32xbf16, #tpu.memory_space<vmem>>, vector<16x32xbf16>
      tpu.vector_store %arg6[%c0_13, %c0_14], %22 {strides = array<i32>} : memref<16x32xbf16, #tpu.memory_space<vmem>>, vector<16x32xbf16>,
    } else {
    }
    %c0 = arith.constant 0 : index
    %c0_1 = arith.constant 0 : index
    %3 = vector.load %arg6[%c0, %c0_1] : memref<16x32xbf16, #tpu.memory_space<vmem>>, vector<16x32xbf16>
    %c0_2 = arith.constant 0 : index
    %c0_3 = arith.constant 0 : index
    %4 = vector.load %arg4[%c0_2, %c0_3] : memref<32x96xbf16, #tpu.memory_space<vmem>>, vector<32x96xbf16>
    %cst = arith.constant dense<0.000000e+00> : vector<16x96xf32>
    %5 = tpu.matmul %3, %4, %cst {dimension_numbers = #tpu.dot_dimension_numbers<[1], [0], [0], [1], [0, 0, 1, 1], [], []>} : vector<16x32xbf16>, vector<32x96xbf16>, vector<16x96xf32> -> vector<16x96xf32>
    %6 = arith.truncf %5 : vector<16x96xf32> to vector<16x96xbf16>
    %c0_4 = arith.constant 0 : index
    %c0_5 = arith.constant 0 : index
    %7 = vector.load %arg5[%c0_4, %c0_5] : memref<16x96xbf16, #tpu.memory_space<vmem>>, vector<16x96xbf16>
    tpu.vector_store %arg5[%c0_4, %c0_5], %6 {strides = array<i32>} : memref<16x96xbf16, #tpu.memory_space<vmem>>, vector<16x96xbf16>,
    return
  }
  func.func @transform_0(%arg0: i32, %arg1: i32) -> (i32, i32) {
    %c0_i32 = arith.constant 0 : i32
    %c0_i32_0 = arith.constant 0 : i32
    return %arg0, %c0_i32 : i32, i32
  }
  func.func @transform_1(%arg0: i32, %arg1: i32) -> (i32, i32) {
    %c0_i32 = arith.constant 0 : i32
    %c0_i32_0 = arith.constant 0 : i32
    %c0_i32_1 = arith.constant 0 : i32
    return %c0_i32, %c0_i32_0 : i32, i32
  }
  func.func @transform_2(%arg0: i32, %arg1: i32) -> (i32, i32) {
    %c0_i32 = arith.constant 0 : i32
    %c0_i32_0 = arith.constant 0 : i32
    return %c0_i32, %arg1 : i32, i32
  }
  func.func @transform_3(%arg0: i32, %arg1: i32) -> (i32, i32) {
    %c0_i32 = arith.constant 0 : i32
    return %arg0, %arg1 : i32, i32
  }
}

module attributes {stable_mosaic.version = 11 : i64} {
  func.func @_attention_kernel(%arg0: i32, %arg1: i32, %arg2: memref<1x1x8x8xbf16, #tpu.memory_space<vmem>>, %arg3: memref<1x1x8x8xbf16, #tpu.memory_space<vmem>>, %arg4: memref<1x1x8x8xbf16, #tpu.memory_space<vmem>>, %arg5: memref<1x8x8xf32, #tpu.memory_space<vmem>>, %arg6: memref<1x1x8xf32, #tpu.memory_space<vmem>>, %arg7: memref<1x8x32xbf16, #tpu.memory_space<vmem>>, %arg8: memref<1x8x32xf32, #tpu.memory_space<vmem>>, %arg9: memref<1x8x32xf32, #tpu.memory_space<vmem>>) attributes {dimension_semantics = [#tpu.dimension_semantics<parallel>, #tpu.dimension_semantics<arbitrary>], iteration_bounds = array<i64: 2, 4>, scalar_prefetch = 0 : i64, scratch_operands = 0 : i64, tpu.core_type = #tpu.core_type<tc>, window_params = [{transform_indices = @transform_0, window_bounds = array<i64: 1, 1, 8, 8>}, {transform_indices = @transform_1, window_bounds = array<i64: 1, 1, 8, 8>}, {transform_indices = @transform_2, window_bounds = array<i64: 1, 1, 8, 8>}, {transform_indices = @transform_3, window_bounds = array<i64: 1, 8, 8>}, {transform_indices = @transform_4, window_bounds = array<i64: 1, 1, 8>}, {transform_indices = @transform_5, window_bounds = array<i64: 1, 8, 32>}, {transform_indices = @transform_6, window_bounds = array<i64: 1, 8, 32>}, {transform_indices = @transform_7, window_bounds = array<i64: 1, 8, 32>}]} {
    %c0_i32 = arith.constant 0 : i32
    %0 = arith.cmpi eq, %arg1, %c0_i32 : i32
    %1 = arith.extui %0 : i1 to i32
    %c0_i32_0 = arith.constant 0 : i32
    %2 = arith.cmpi ne, %1, %c0_i32_0 : i32
    scf.if %2 {
      %c0_31 = arith.constant 0 : index
      %c0_32 = arith.constant 0 : index
      %c0_33 = arith.constant 0 : index
      %39 = vector.load %arg8[%c0_31, %c0_32, %c0_33] : memref<1x8x32xf32, #tpu.memory_space<vmem>>, vector<1x8x32xf32>
      %c0_34 = arith.constant 0 : index
      %c0_35 = arith.constant 0 : index
      %c0_36 = arith.constant 0 : index
      %40 = vector.load %arg9[%c0_34, %c0_35, %c0_36] : memref<1x8x32xf32, #tpu.memory_space<vmem>>, vector<1x8x32xf32>
      tpu.vector_store %arg9[%c0_34, %c0_35, %c0_36], %39 {strides = array<i32>} : memref<1x8x32xf32, #tpu.memory_space<vmem>>, vector<1x8x32xf32>,
    } else {
    }
    %c0 = arith.constant 0 : index
    %c0_1 = arith.constant 0 : index
    %c0_2 = arith.constant 0 : index
    %c0_3 = arith.constant 0 : index
    %3 = vector.load %arg2[%c0, %c0_1, %c0_2, %c0_3] : memref<1x1x8x8xbf16, #tpu.memory_space<vmem>>, vector<1x1x8x8xbf16>
    %4 = vector.shape_cast %3 : vector<1x1x8x8xbf16> to vector<8x8xbf16>
    %c0_4 = arith.constant 0 : index
    %c0_5 = arith.constant 0 : index
    %c0_6 = arith.constant 0 : index
    %c0_7 = arith.constant 0 : index
    %5 = vector.load %arg3[%c0_4, %c0_5, %c0_6, %c0_7] : memref<1x1x8x8xbf16, #tpu.memory_space<vmem>>, vector<1x1x8x8xbf16>
    %6 = vector.shape_cast %5 : vector<1x1x8x8xbf16> to vector<8x8xbf16>
    %c0_8 = arith.constant 0 : index
    %c0_9 = arith.constant 0 : index
    %c0_10 = arith.constant 0 : index
    %c0_11 = arith.constant 0 : index
    %7 = vector.load %arg4[%c0_8, %c0_9, %c0_10, %c0_11] : memref<1x1x8x8xbf16, #tpu.memory_space<vmem>>, vector<1x1x8x8xbf16>
    %8 = vector.shape_cast %7 : vector<1x1x8x8xbf16> to vector<8x8xbf16>
    %cst = arith.constant dense<0.000000e+00> : vector<8x8xf32>
    %9 = tpu.matmul %4, %6, %cst {dimension_numbers = #tpu.dot_dimension_numbers<[1], [1], [0], [0], [0, 0, 1, 0], [], []>} : vector<8x8xbf16>, vector<8x8xbf16>, vector<8x8xf32> -> vector<8x8xf32>
    %c0_12 = arith.constant 0 : index
    %c0_13 = arith.constant 0 : index
    %c0_14 = arith.constant 0 : index
    %10 = vector.load %arg5[%c0_12, %c0_13, %c0_14] : memref<1x8x8xf32, #tpu.memory_space<vmem>>, vector<1x8x8xf32>
    %11 = vector.shape_cast %10 : vector<1x8x8xf32> to vector<8x8xf32>
    %12 = arith.addf %9, %11 : vector<8x8xf32>
    %c0_15 = arith.constant 0 : index
    %c0_16 = arith.constant 0 : index
    %c0_17 = arith.constant 0 : index
    %13 = vector.load %arg6[%c0_15, %c0_16, %c0_17] : memref<1x1x8xf32, #tpu.memory_space<vmem>>, vector<1x1x8xf32>
    %14 = vector.shape_cast %13 : vector<1x1x8xf32> to vector<1x8xf32>
    %15 = vector.broadcast %14 : vector<1x8xf32> to vector<8x8xf32>
    %16 = arith.addf %12, %15 : vector<8x8xf32>
    %cst_18 = arith.constant dense<0xFF800000> : vector<8xf32>
    %17 = vector.multi_reduction <maximumf>, %16, %cst_18 [1] : vector<8x8xf32> to vector<8xf32>
    %18 = vector.shape_cast %17 : vector<8xf32> to vector<8x1xf32>
    %19 = vector.broadcast %18 : vector<8x1xf32> to vector<8x8xf32>
    %20 = arith.subf %16, %19 : vector<8x8xf32>
    %21 = math.exp %20 : vector<8x8xf32>
    %cst_19 = arith.constant dense<0.000000e+00> : vector<8xf32>
    %22 = vector.multi_reduction <add>, %21, %cst_19 [1] : vector<8x8xf32> to vector<8xf32>
    %23 = vector.shape_cast %22 : vector<8xf32> to vector<8x1xf32>
    %24 = tpu.reciprocal %23 {approx = true} : vector<8x1xf32> -> vector<8x1xf32>
    %25 = vector.broadcast %24 : vector<8x1xf32> to vector<8x8xf32>
    %26 = arith.mulf %21, %25 : vector<8x8xf32>
    %27 = arith.truncf %26 : vector<8x8xf32> to vector<8x8xbf16>
    %cst_20 = arith.constant dense<0.000000e+00> : vector<8x8xf32>
    %28 = tpu.matmul %27, %8, %cst_20 {dimension_numbers = #tpu.dot_dimension_numbers<[1], [0], [0], [1], [0, 0, 1, 1], [], []>} : vector<8x8xbf16>, vector<8x8xbf16>, vector<8x8xf32> -> vector<8x8xf32>
    %29 = arith.truncf %28 : vector<8x8xf32> to vector<8x8xbf16>
    %c0_21 = arith.constant 0 : index
    %c0_22 = arith.constant 0 : index
    %c0_23 = arith.constant 0 : index
    %30 = vector.load %arg7[%c0_21, %c0_22, %c0_23] : memref<1x8x32xbf16, #tpu.memory_space<vmem>>, vector<1x8x32xbf16>
    %31 = vector.shape_cast %30 : vector<1x8x32xbf16> to vector<8x32xbf16>
    %cst_24 = arith.constant dense<0.000000e+00> : vector<8x32xf32>
    %32 = tpu.matmul %29, %31, %cst_24 {dimension_numbers = #tpu.dot_dimension_numbers<[1], [0], [0], [1], [0, 0, 1, 1], [], []>} : vector<8x8xbf16>, vector<8x32xbf16>, vector<8x32xf32> -> vector<8x32xf32>
    %c0_25 = arith.constant 0 : index
    %c0_26 = arith.constant 0 : index
    %c0_27 = arith.constant 0 : index
    %33 = vector.load %arg9[%c0_25, %c0_26, %c0_27] : memref<1x8x32xf32, #tpu.memory_space<vmem>>, vector<1x8x32xf32>
    %34 = vector.shape_cast %33 : vector<1x8x32xf32> to vector<8x32xf32>
    %35 = arith.addf %34, %32 : vector<8x32xf32>
    %c0_28 = arith.constant 0 : index
    %c0_29 = arith.constant 0 : index
    %c0_30 = arith.constant 0 : index
    %36 = vector.load %arg9[%c0_28, %c0_29, %c0_30] : memref<1x8x32xf32, #tpu.memory_space<vmem>>, vector<1x8x32xf32>
    %37 = vector.shape_cast %36 : vector<1x8x32xf32> to vector<8x32xf32>
    %38 = vector.shape_cast %35 : vector<8x32xf32> to vector<1x8x32xf32>
    tpu.vector_store %arg9[%c0_28, %c0_29, %c0_30], %38 {strides = array<i32>} : memref<1x8x32xf32, #tpu.memory_space<vmem>>, vector<1x8x32xf32>,
    return
  }
  func.func @transform_0(%arg0: i32, %arg1: i32) -> (i32, i32, i32, i32) {
    %c0_i32 = arith.constant 0 : i32
    %c0_i32_0 = arith.constant 0 : i32
    %c0_i32_1 = arith.constant 0 : i32
    return %arg0, %arg1, %c0_i32, %c0_i32_0 : i32, i32, i32, i32
  }
  func.func @transform_1(%arg0: i32, %arg1: i32) -> (i32, i32, i32, i32) {
    %c0_i32 = arith.constant 0 : i32
    %c0_i32_0 = arith.constant 0 : i32
    %c0_i32_1 = arith.constant 0 : i32
    return %arg0, %arg1, %c0_i32, %c0_i32_0 : i32, i32, i32, i32
  }
  func.func @transform_2(%arg0: i32, %arg1: i32) -> (i32, i32, i32, i32) {
    %c0_i32 = arith.constant 0 : i32
    %c0_i32_0 = arith.constant 0 : i32
    %c0_i32_1 = arith.constant 0 : i32
    return %arg0, %arg1, %c0_i32, %c0_i32_0 : i32, i32, i32, i32
  }
  func.func @transform_3(%arg0: i32, %arg1: i32) -> (i32, i32, i32) {
    %c0_i32 = arith.constant 0 : i32
    %c0_i32_0 = arith.constant 0 : i32
    %c0_i32_1 = arith.constant 0 : i32
    return %arg1, %c0_i32, %c0_i32_0 : i32, i32, i32
  }
  func.func @transform_4(%arg0: i32, %arg1: i32) -> (i32, i32, i32) {
    %c0_i32 = arith.constant 0 : i32
    %c0_i32_0 = arith.constant 0 : i32
    %c0_i32_1 = arith.constant 0 : i32
    return %arg0, %c0_i32, %c0_i32_0 : i32, i32, i32
  }
  func.func @transform_5(%arg0: i32, %arg1: i32) -> (i32, i32, i32) {
    %c0_i32 = arith.constant 0 : i32
    %c0_i32_0 = arith.constant 0 : i32
    %c0_i32_1 = arith.constant 0 : i32
    return %arg1, %c0_i32, %c0_i32_0 : i32, i32, i32
  }
  func.func @transform_6(%arg0: i32, %arg1: i32) -> (i32, i32, i32) {
    %c0_i32 = arith.constant 0 : i32
    %c0_i32_0 = arith.constant 0 : i32
    %c0_i32_1 = arith.constant 0 : i32
    return %arg0, %c0_i32, %c0_i32_0 : i32, i32, i32
  }
  func.func @transform_7(%arg0: i32, %arg1: i32) -> (i32, i32, i32) {
    %c0_i32 = arith.constant 0 : i32
    %c0_i32_0 = arith.constant 0 : i32
    %c0_i32_1 = arith.constant 0 : i32
    return %arg0, %c0_i32, %c0_i32_0 : i32, i32, i32
  }
}

module attributes {stable_mosaic.version = 11 : i64} {
  func.func @_rmsnorm_ffn_kernel(%arg0: i32, %arg1: i32, %arg2: memref<16x32xf32, #tpu.memory_space<vmem>>, %arg3: memref<1x32xf32, #tpu.memory_space<vmem>>, %arg4: memref<32x64xbf16, #tpu.memory_space<vmem>>, %arg5: memref<64x32xbf16, #tpu.memory_space<vmem>>, %arg6: memref<16x32xf32, #tpu.memory_space<vmem>>, %arg7: memref<16x32xf32, #tpu.memory_space<vmem>>, %arg8: memref<16x32xbf16, #tpu.memory_space<vmem>>) attributes {dimension_semantics = [#tpu.dimension_semantics<parallel>, #tpu.dimension_semantics<arbitrary>], iteration_bounds = array<i64: 1, 1>, scalar_prefetch = 0 : i64, scratch_operands = 2 : i64, tpu.core_type = #tpu.core_type<tc>, window_params = [{transform_indices = @transform_0, window_bounds = array<i64: 16, 32>}, {pipeline_mode = #tpu.pipeline_mode<synchronous>, transform_indices = @transform_1, window_bounds = array<i64: 1, 32>}, {transform_indices = @transform_2, window_bounds = array<i64: 32, 64>}, {transform_indices = @transform_3, window_bounds = array<i64: 64, 32>}, {transform_indices = @transform_4, window_bounds = array<i64: 16, 32>}]} {
    %c0_i32 = arith.constant 0 : i32
    %0 = arith.cmpi eq, %arg1, %c0_i32 : i32
    %1 = arith.extui %0 : i1 to i32
    %c0_i32_0 = arith.constant 0 : i32
    %2 = arith.cmpi ne, %1, %c0_i32_0 : i32
    scf.if %2 {
      %c0_14 = arith.constant 0 : index
      %c0_15 = arith.constant 0 : index
      %17 = vector.load %arg2[%c0_14, %c0_15] : memref<16x32xf32, #tpu.memory_space<vmem>>, vector<16x32xf32>
      %18 = arith.mulf %17, %17 : vector<16x32xf32>
      %cst_16 = arith.constant dense<0.000000e+00> : vector<16xf32>
      %19 = vector.multi_reduction <add>, %18, %cst_16 [1] : vector<16x32xf32> to vector<16xf32>
      %20 = vector.shape_cast %19 : vector<16xf32> to vector<16x1xf32>
      %cst_17 = arith.constant 3.200000e+01 : f32
      %21 = vector.broadcast %cst_17 : f32 to vector<16x1xf32>
      %22 = arith.divf %20, %21 : vector<16x1xf32>
      %cst_18 = arith.constant 9.99999997E-7 : f32
      %23 = vector.broadcast %cst_18 : f32 to vector<16x1xf32>
      %24 = arith.addf %22, %23 : vector<16x1xf32>
      %25 = math.rsqrt %24 : vector<16x1xf32>
      %26 = vector.broadcast %25 : vector<16x1xf32> to vector<16x32xf32>
      %27 = arith.mulf %17, %26 : vector<16x32xf32>
      %c0_19 = arith.constant 0 : index
      %c0_20 = arith.constant 0 : index
      %28 = vector.load %arg3[%c0_19, %c0_20] : memref<1x32xf32, #tpu.memory_space<vmem>>, vector<1x32xf32>
      %29 = vector.broadcast %28 : vector<1x32xf32> to vector<16x32xf32>
      %30 = arith.mulf %27, %29 : vector<16x32xf32>
      %31 = arith.truncf %30 : vector<16x32xf32> to vector<16x32xbf16>
      %c0_21 = arith.constant 0 : index
      %c0_22 = arith.constant 0 : index
      %32 = vector.load %arg8[%c0_21, %c0_22] : memref<16x32xbf16, #tpu.memory_space<vmem>>, vector<16x32xbf16>
      tpu.vector_store %arg8[%c0_21, %c0_22], %31 {strides = array<i32>} : memref<16x32xbf16, #tpu.memory_space<vmem>>, vector<16x32xbf16>,
      %c0_23 = arith.constant 0 : index
      %c0_24 = arith.constant 0 : index
      %33 = vector.load %arg7[%c0_23, %c0_24] : memref<16x32xf32, #tpu.memory_space<vmem>>, vector<16x32xf32>
      tpu.vector_store %arg7[%c0_23, %c0_24], %17 {strides = array<i32>} : memref<16x32xf32, #tpu.memory_space<vmem>>, vector<16x32xf32>,
    } else {
    }
    %c0 = arith.constant 0 : index
    %c0_1 = arith.constant 0 : index
    %3 = vector.load %arg8[%c0, %c0_1] : memref<16x32xbf16, #tpu.memory_space<vmem>>, vector<16x32xbf16>
    %c0_2 = arith.constant 0 : index
    %c0_3 = arith.constant 0 : index
    %4 = vector.load %arg4[%c0_2, %c0_3] : memref<32x64xbf16, #tpu.memory_space<vmem>>, vector<32x64xbf16>
    %cst = arith.constant dense<0.000000e+00> : vector<16x64xf32>
    %5 = tpu.matmul %3, %4, %cst {dimension_numbers = #tpu.dot_dimension_numbers<[1], [0], [0], [1], [0, 0, 1, 1], [], []>} : vector<16x32xbf16>, vector<32x64xbf16>, vector<16x64xf32> -> vector<16x64xf32>
    %cst_4 = arith.constant 0.000000e+00 : f32
    %6 = vector.broadcast %cst_4 : f32 to vector<16x64xf32>
    %7 = arith.maximumf %5, %6 : vector<16x64xf32>
    %8 = arith.truncf %7 : vector<16x64xf32> to vector<16x64xbf16>
    %c0_5 = arith.constant 0 : index
    %c0_6 = arith.constant 0 : index
    %9 = vector.load %arg7[%c0_5, %c0_6] : memref<16x32xf32, #tpu.memory_space<vmem>>, vector<16x32xf32>
    %c0_7 = arith.constant 0 : index
    %c0_8 = arith.constant 0 : index
    %10 = vector.load %arg5[%c0_7, %c0_8] : memref<64x32xbf16, #tpu.memory_space<vmem>>, vector<64x32xbf16>
    %cst_9 = arith.constant dense<0.000000e+00> : vector<16x32xf32>
    %11 = tpu.matmul %8, %10, %cst_9 {dimension_numbers = #tpu.dot_dimension_numbers<[1], [0], [0], [1], [0, 0, 1, 1], [], []>} : vector<16x64xbf16>, vector<64x32xbf16>, vector<16x32xf32> -> vector<16x32xf32>
    %12 = arith.addf %9, %11 : vector<16x32xf32>
    %c0_10 = arith.constant 0 : index
    %c0_11 = arith.constant 0 : index
    %13 = vector.load %arg7[%c0_10, %c0_11] : memref<16x32xf32, #tpu.memory_space<vmem>>, vector<16x32xf32>
    tpu.vector_store %arg7[%c0_10, %c0_11], %12 {strides = array<i32>} : memref<16x32xf32, #tpu.memory_space<vmem>>, vector<16x32xf32>,
    %c0_i32_12 = arith.constant 0 : i32
    %14 = arith.cmpi eq, %arg1, %c0_i32_12 : i32
    %15 = arith.extui %14 : i1 to i32
    %c0_i32_13 = arith.constant 0 : i32
    %16 = arith.cmpi ne, %15, %c0_i32_13 : i32
    scf.if %16 {
      %c0_14 = arith.constant 0 : index
      %c0_15 = arith.constant 0 : index
      %17 = vector.load %arg7[%c0_14, %c0_15] : memref<16x32xf32, #tpu.memory_space<vmem>>, vector<16x32xf32>
      %c0_16 = arith.constant 0 : index
      %c0_17 = arith.constant 0 : index
      %18 = vector.load %arg6[%c0_16, %c0_17] : memref<16x32xf32, #tpu.memory_space<vmem>>, vector<16x32xf32>
      tpu.vector_store %arg6[%c0_16, %c0_17], %17 {strides = array<i32>} : memref<16x32xf32, #tpu.memory_space<vmem>>, vector<16x32xf32>,
    } else {
    }
    return
  }
  func.func @transform_0(%arg0: i32, %arg1: i32) -> (i32, i32) {
    %c0_i32 = arith.constant 0 : i32
    %c0_i32_0 = arith.constant 0 : i32
    return %arg0, %c0_i32 : i32, i32
  }
  func.func @transform_1(%arg0: i32, %arg1: i32) -> (i32, i32) {
    %c0_i32 = arith.constant 0 : i32
    %c0_i32_0 = arith.constant 0 : i32
    %c0_i32_1 = arith.constant 0 : i32
    return %c0_i32, %c0_i32_0 : i32, i32
  }
  func.func @transform_2(%arg0: i32, %arg1: i32) -> (i32, i32) {
    %c0_i32 = arith.constant 0 : i32
    %c0_i32_0 = arith.constant 0 : i32
    return %c0_i32, %arg1 : i32, i32
  }
  func.func @transform_3(%arg0: i32, %arg1: i32) -> (i32, i32) {
    %c0_i32 = arith.constant 0 : i32
    %c0_i32_0 = arith.constant 0 : i32
    return %arg1, %c0_i32 : i32, i32
  }
  func.func @transform_4(%arg0: i32, %arg1: i32) -> (i32, i32) {
    %c0_i32 = arith.constant 0 : i32
    %c0_i32_0 = arith.constant 0 : i32
    return %arg0, %c0_i32 : i32, i32
  }
}

</mosaic_0001>

<bundles_post_ra>
// kernel: codet5_classifier_forward.6
= control target key start
LH: loop header
LB: loop body
LE: loop exit
PB: predicated region body
PF: predicated region fallthrough
CT: control target
= control target key end

     0   :  { %vm23_vm0 = vcmask 261120   ;;  %v154_v7 = vmov 0.0   ;;  %vm155_vm1 = vmmov 0   ;;  %vm120_vm2 = vcmask 781312   ;;  %s201_s0 = inlined_call_operand.vmem [shape: f32[16,32], index: 0, kind: input, shape index: {}]   ;;  %s202_s2 = inlined_call_operand.vmem [shape: bf16[32,96], index: 2, kind: input, shape index: {}]   ;;  %s203_s1 = inlined_call_operand.vmem [shape: f32[1,32], index: 1, kind: input, shape index: {}]   ;;  %s204_s3 = inlined_call_operand.vmem [shape: bf16[16,96], index: 3, kind: output, shape index: {}]  }
   0x1   :  { %v19_v0 = vld [vmem:[%s201_s0] sm:$0xff]  ;;  %v20_v1 = vld [vmem:[%s201_s0 + $0x8] sm:$0xff]  ;;  %138 = vmatprep.subr.bf16.mxu0 %v154_v7  ;;  %142 = vmatprep.mubr.msk.bf16.mxu0 %vm155_vm1, %v154_v7 }
   0x2   :  { %v21_v2 = vmul.f32 %v19_v0, %v19_v0  ;;  %v22_v3 = vmul.f32 %v20_v1, %v20_v1  ;;  %v148_v6 = vld [vmem:[%s202_s2] sm:$0xff]   ;;  %v149_v8 = vld [vmem:[%s202_s2 + $0x8] sm:$0xff]  }
   0x3   :  { %139 = vmatpush3.bf16.msra.mxu0 %v148_v6  ;;  %v127_v18 = vld [vmem:[%s203_s1] ss:$0 sm:$0xff] }
   0x4   :  { %v24_v4 = vsel %vm23_vm0, %v21_v2, 0.0  ;;  %v27_v5 = vsel %vm23_vm0, %v22_v3, 0.0  ;;  %140 = vmatprep.subr.bf16.mxu0 %v154_v7 }
   0x5   :  { %25 = vadd.xlane.f32.xlu0 %v24_v4 }
   0x7   :  { %141 = vmatpush3.bf16.msra.mxu0 %v149_v8 }
   0x9   :  { %28 = vadd.xlane.f32.xlu0 %v27_v5 }
  0x92   :  { %v26_v9 = vpop.xlane.xlu0 %25 }
  0x93   :  { %v31_v10 = vmul.f32 0.03125, %v26_v9 }
  0x95   :  { %v33_v11 = vadd.f32 1e-06, %v31_v10 }
  0x96   :  { %v29_v12 = vpop.xlane.xlu0 %28 }
  0x97   :  { %150 = vrsqrt.f32 %v33_v11  ;;  %v32_v13 = vmul.f32 0.03125, %v29_v12 }
  0x99   :  { %v34_v14 = vadd.f32 1e-06, %v32_v13 }
  0x9b   :  { %152 = vrsqrt.f32 %v34_v14 }
  0xa1   :  { %v151_v15 = vpop.eup %150 }
  0xa2   :  { %v37_v16 = vmul.f32 %v151_v15, %v19_v0 }
  0xa4   :  { %v46_v20 = vmul.f32 %v127_v18, %v37_v16 }
  0xa5   :  { %v153_v17 = vpop.eup %152 }
  0xa6   :  { %v38_v19 = vmul.f32 %v153_v17, %v20_v1 }
  0xa8   :  { %v47_v21 = vmul.f32 %v127_v18, %v38_v19 }
  0xaa   :  { %v48_v22 = vpack.c.bf16 %v47_v21, %v46_v20 }
  0xac   :  { %49 = vst.msk [vmem:[#allocation2] sm:$0xff] %vm23_vm0, %v48_v22 }
  0xb3   :  { %v50_v23 = vld [vmem:[#allocation2] sm:$0xff] }
  0xb4   :  { %143 = vmatmul.mubr.msk.bf16.vlgmr.msra.gmra.mrb[0].mxu0 %vm23_vm0, %v50_v23 }
 0x187   :  { %v105_v24 = vpop.f32.mrb[0].mxu0 }
 0x188   :  { %v133_v25 = vpack.c.bf16 %v105_v24, %v105_v24  ;;  %v144_v26 = vpop.f32.mrb[1].mxu0 }
 0x189   :  { %v108_v27 = vpop.f32.mrb[2].mxu0 }
 0x18a   :  { %121 = vst.msk [vmem:[%s204_s3] sm:$0xf] %vm120_vm2, %v133_v25  ;;  %v134_v28 = vpack.c.bf16 %v108_v27, %v108_v27  ;;  %v145_v29 = vpop.f32.mrb[3].mxu0 }
 0x18c   :  { %122 = vst.msk [vmem:[%s204_s3 + $0x4] sm:$0xf] %vm120_vm2, %v134_v28 }

// kernel: codet5_classifier_forward.7
= control target key start
LH: loop header
LB: loop body
LE: loop exit
PB: predicated region body
PF: predicated region fallthrough
CT: control target
= control target key end

     0   :  { %s930_s24 = smov 0   ;;  %s932_s25 = smov 0   ;;  %s1041_s0 = inlined_call_operand.vmem [shape: bf16[2,4,8,8], index: 0, kind: input, shape index: {}]   ;;  %s1042_s1 = inlined_call_operand.vmem [shape: bf16[2,4,8,8], index: 1, kind: input, shape index: {}]   ;;  %s1043_s2 = inlined_call_operand.vmem [shape: bf16[2,4,8,8], index: 2, kind: input, shape index: {}]   ;;  %s1044_s3 = inlined_call_operand.vmem [shape: f32[4,8,8], index: 3, kind: input, shape index: {}]   ;;  %s1045_s4 = inlined_call_operand.vmem [shape: f32[2,1,8], index: 4, kind: input, shape index: {}]   ;;  %s1046_s5 = inlined_call_operand.vmem [shape: bf16[4,8,32], index: 5, kind: input, shape index: {}]   ;;  %s1047_s6 = inlined_call_operand.vmem [shape: f32[2,8,32], index: 6, kind: input, shape index: {}]   ;;  %s1048_s7 = inlined_call_operand.vmem [shape: f32[2,8,32], index: 7, kind: output, shape index: {}]  }
   0x1   :  { %1049 = sst [smem:[#allocation4_spill]] %s1041_s0  ;;  %s934_s26 = smov 0  }
   0x2   :  { %1050 = sst [smem:[#allocation5_spill]] %s1044_s3  ;;  %s936_s27 = smov 0  }
   0x3   :  { %s938_s28 = smov 0  }
   0x4 LB: > { %s26_s29 = sadd.s32 1, %s878_s26  ;;  %s29_s30 = sadd.s32 1, %s882_s27  ;;  %s886_s28 = sphi %s938_s28, %s17_s28   ;;  %s882_s27 = sphi %s936_s27, %s1061_s27   ;;  %s878_s26 = sphi %s934_s26, %s1060_s26   ;;  %s874_s25 = sphi %s932_s25, %s1059_s25   ;;  %s870_s24 = sphi %s930_s24, %s1058_s24  }
   0x5   : > { %p27_p0 = scmp.ge.s32.totalorder %s26_s29, 4  ;;  %p760_p1 = scmp.ge.s32.totalorder %s886_s28, 1 }
   0x6   : > { %p319_p2 = scmp.lt.s32.totalorder %s886_s28, 9 }
   0x7   : > { %s1063_s29 = smov (%p27_p0, %s26_s29), 0  ;;  %s1065_s30 = smov (!%p27_p0, %s29_s30), %s882_s27 }
   0x8   : > { %1051 = sst [smem:[#allocation2_spill]] %s1063_s29  ;;  %p320_p3 = pnand %p760_p1, %p319_p2 }
   0x9   : > { %p31_p4 = scmp.ge.s32.totalorder %s1065_s30, 2  ;;  %p384_p5 = scmp.lt.s32.totalorder (!%p320_p3), %s874_s25, 1 }
   0xa   : > { %323 = sbr.rel (%p320_p3) target bundleno = 1002 (0x3ea), region = 48  ;;  %p386_p6 = scmp.lt.s32.totalorder (!%p320_p3), %s870_s24, 3 }
   0xb   : > { %s1067_s30 = smov (%p31_p4, %s1065_s30), 0  ;;  %s1053_s3 = sld [smem:[#allocation5_spill]] (!%p320_p3) }
   0xc   : > { %1052 = sst [smem:[#allocation3_spill]] %s1067_s30  ;;  %s1054_s0 = sld [smem:[#allocation4_spill]] (!%p320_p3) }
   0xd   : > { %p771_p7 = scmp.ne.s32.totalorder (!%p320_p3), %s870_s24, 0 }
  0x11   : > { %s1069_s25 = smov (!%p384_p5, %s874_s25), 1  ;;  %vm433_vm0 = vcmask (!%p771_p7), 261120  }
  0x12   : > { %s387_s8 = scalar_select %p386_p6, %s870_s24, 3 }
  0x13   : > { %s761_s9 = sshll.u32 %s1069_s25, 2  ;;  %s769_s17 = sshll.u32 %s1069_s25, 3 }
  0x14   : > { %s389_s13 = sadd.s32 %s761_s9, %s387_s8  ;;  %s767_s14 = sshll.u32 %s387_s8, 3 }
  0x15   : > { %s971_s15 = sshll.u32 %s389_s13, 2  ;;  %s411_s18 = scalar_lea.vmem %s1053_s3, %s767_s14 }
  0x16   : > { %s391_s21 = scalar_lea.vmem %s1054_s0, %s971_s15  ;;  %s399_s10 = scalar_lea.vmem %s1042_s1, %s971_s15 }
  0x17   : > { %s407_s13 = scalar_lea.vmem %s1043_s2, %s971_s15  ;;  %s768_s12 = sshll.u32 %s387_s8, 2 }
  0x18   : > { %s991_s16 = scalar_lea.vmem %s1046_s5, %s768_s12  ;;  %s422_s19 = scalar_lea.vmem %s1047_s6, %s769_s17 }
  0x19   : > { %s1000_s22 = scalar_lea.vmem %s1048_s7, %s769_s17  ;;  %431 = sbr.rel (%p771_p7) target bundleno = 32 (0x20), region = 52  ;;  %v432_v0 = vld [vmem:[%s422_s19] sm:$0xff] (!%p771_p7) }
  0x1a   : > { %434 = vst.msk [vmem:[%s1000_s22] sm:$0xff] (!%p771_p7), %vm433_vm0, %v432_v0 }
  0x20 PF: > { %v436_v1 = vld [vmem:[%s399_s10] sm:$0xf]  ;;  %vm439_vm1 = vcmask 64512   ;;  %v888_v2 = vmov 0.0   ;;  %vm889_vm2 = vmmov 0   ;;  %s1055_s24 = scalar_lea.vmem %s1045_s4, %s1069_s25  ;;  %vm509_vm3 = vcmask 1043456  }
  0x21   : > { %784 = vmatprep.subr.bf16.mxu0 %v888_v2  ;;  %v444_v3 = vsel %vm439_vm1, %v436_v1, 0  ;;  %786 = vmatprep.mubr.msk.bf16.mxu0 %vm889_vm2, %v888_v2  ;;  %v435_v4 = vld [vmem:[%s391_s21] sm:$0xf]  ;;  %vm603_vm4 = vcmask 261120  }
  0x22   : > { %785 = vmatpush3.bf16.xpose.msra.mxu0 %v444_v3  ;;  %790 = vmatprep.subr.bf16.mxu1 %v888_v2  ;;  %v438_v5 = vld [vmem:[%s411_s18] sm:$0xff] }
  0x23   : > { %792 = vmatprep.mubr.msk.bf16.mxu1 %vm889_vm2, %v888_v2  ;;  %v773_v7 = vld [vmem:[%s1055_s24] ss:$0 sm:$0xff] }
  0x24   : > { %v437_v19 = vld [vmem:[%s407_s13] sm:$0xf] }
  0x25   : > { %v511_v20 = vsel %vm509_vm3, %v437_v19, 0  ;;  %v554_v23 = vld [vmem:[%s991_s16] sm:$0xf] }
  0x26   : > { %791 = vmatpush3.bf16.msra.mxu1 %v511_v20  ;;  %v559_v25 = vsel %vm509_vm3, %v554_v23, 0  ;;  %v601_v32 = vld [vmem:[%s1000_s22] sm:$0xff] }
  0x27   : > { %796 = vmatprep.subr.bf16.mxu1 %v888_v2 }
  0x29   : > { %787 = vmatmul.mubr.msk.bf16.vlgmr.msra.gmra.mrb[0].mxu0 %vm439_vm1, %v435_v4 }
  0xfc   : > { %v480_v6 = vpop.f32.mrb[0].mxu0 }
  0xfd   : > { %v481_v8 = vadd.f32 %v480_v6, %v438_v5  ;;  %v788_v9 = vpop.f32.mrb[1].mxu0 }
  0xfe   : > { %v483_v10 = vpop.f32.mrb[2].mxu0 }
  0xff   : > { %v789_v11 = vpop.f32.mrb[3].mxu0  ;;  %v493_v12 = vadd.f32 %v773_v7, %v481_v8 }
 0x101   : > { %v494_v13 = vsel %vm439_vm1, %v493_v12, -inf }
 0x102   : > { %495 = vmax.xlane.f32.xlu0 %v494_v13 }
 0x18f   : > { %v496_v14 = vpop.xlane.xlu0 %495 }
 0x190   : > { %v497_v15 = vsub.f32 %v493_v12, %v496_v14 }
 0x192   : > { %v498_v16 = vmul.f32 1.442695, %v497_v15 }
 0x194   : > { %844 = vpow2.f32 %v498_v16 }
 0x19e   : > { %v845_v17 = vpop.eup %844 }
 0x19f   : > { %v500_v18 = vsel %vm439_vm1, %v845_v17, 0.0 }
 0x1a0   : > { %501 = vadd.xlane.f32.xlu0 %v500_v18 }
 0x22d   : > { %v502_v21 = vpop.xlane.xlu0 %501 }
 0x22e   : > { %846 = vrcp.f32 %v502_v21 }
 0x238   : > { %v847_v22 = vpop.eup %846 }
 0x239   : > { %v504_v24 = vmul.f32 %v847_v22, %v845_v17 }
 0x23b   : > { %v505_v26 = vpack.c.bf16 %v504_v24, %v504_v24 }
 0x23d   : > { %793 = vmatmul.mubr.msk.bf16.vlgmr.msra.gmra.mrb[0].mxu1 %vm439_vm1, %v505_v26 }
 0x23e   : > { %797 = vmatpush3.bf16.msra.mxu1 %v559_v25  ;;  %798 = vmatprep.mubr.msk.bf16.mxu1 %vm889_vm2, %v888_v2 }
 0x310   : > { %v547_v27 = vpop.f32.mrb[0].mxu1 }
 0x311   : > { %v553_v28 = vpack.c.bf16 %v547_v27, %v547_v27  ;;  %v794_v29 = vpop.f32.mrb[1].mxu1 }
 0x312   : > { %v550_v30 = vpop.f32.mrb[2].mxu1 }
 0x313   : > { %v795_v31 = vpop.f32.mrb[3].mxu1  ;;  %799 = vmatmul.mubr.msk.bf16.vlgmr.msra.gmra.mrb[4].mxu1 %vm439_vm1, %v553_v28 }
 0x3e6   : > { %v595_v33 = vpop.f32.mrb[4].mxu1 }
 0x3e7   : > { %v602_v34 = vadd.f32 %v601_v32, %v595_v33  ;;  %v800_v35 = vpop.f32.mrb[5].mxu1 }
 0x3e8   : > { %v598_v36 = vpop.f32.mrb[6].mxu1 }
 0x3e9   : > { %604 = vst.msk [vmem:[%s1000_s22] sm:$0xff] %vm603_vm4, %v602_v34  ;;  %v801_v37 = vpop.f32.mrb[7].mxu1 }
 0x3ea PF: > { %s17_s28 = sadd.s32 1, %s886_s28   ;;  %s1056_s30 = sld [smem:[#allocation2_spill]] }
 0x3eb   : > { %p14_p8 = scmp.ge.s32.totalorder %s17_s28, 10   ;;  %s1057_s8 = sld [smem:[#allocation3_spill]] }
 0x3ec   : > { %s1058_s24 = smov %s878_s26  ;;  %s1059_s25 = smov %s882_s27 }
 0x3ed   :  { %16 = sbr.rel (!%p14_p8) target bundleno = 4 (0x4), region = 100 }
 0x3f0   : > { %s1060_s26 = smov %s1056_s30 }
 0x3f1   : > { %s1061_s27 = smov %s1057_s8 }

// kernel: codet5_classifier_forward.8
= control target key start
LH: loop header
LB: loop body
LE: loop exit
PB: predicated region body
PF: predicated region fallthrough
CT: control target
= control target key end

     0   :  { %vm26_vm0 = vcmask 261120   ;;  %v263_v7 = vmov 0.0   ;;  %vm264_vm1 = vmmov 0   ;;  %vm154_vm2 = vcmask 523264   ;;  %s333_s0 = inlined_call_operand.vmem [shape: f32[16,32], index: 0, kind: input, shape index: {}]   ;;  %s334_s2 = inlined_call_operand.vmem [shape: bf16[32,64], index: 2, kind: input, shape index: {}]   ;;  %s335_s3 = inlined_call_operand.vmem [shape: bf16[64,32], index: 3, kind: input, shape index: {}]   ;;  %s336_s1 = inlined_call_operand.vmem [shape: f32[1,32], index: 1, kind: input, shape index: {}]   ;;  %s337_s4 = inlined_call_operand.vmem [shape: f32[16,32], index: 4, kind: output, shape index: {}]  }
   0x1   :  { %v22_v0 = vld [vmem:[%s333_s0] sm:$0xff]  ;;  %v23_v1 = vld [vmem:[%s333_s0 + $0x8] sm:$0xff]  ;;  %231 = vmatprep.subr.bf16.mxu0 %v263_v7  ;;  %239 = vmatprep.subr.bf16.mxu1 %v263_v7  ;;  %v257_v26 = vld [vmem:[%s335_s3 + $0x10] sm:$0xff]  }
   0x2   :  { %v24_v2 = vmul.f32 %v22_v0, %v22_v0  ;;  %53 = vst.msk [vmem:[#allocation2] sm:$0xff] %vm26_vm0, %v22_v0  ;;  %v25_v3 = vmul.f32 %v23_v1, %v23_v1  ;;  %54 = vst.msk [vmem:[#allocation2 + $0x8] sm:$0xff] %vm26_vm0, %v23_v1  ;;  %v253_v6 = vld [vmem:[%s334_s2] sm:$0xff]   ;;  %v254_v8 = vld [vmem:[%s334_s2 + $0x8] sm:$0xff]   ;;  %235 = vmatprep.mubr.msk.bf16.mxu0 %vm264_vm1, %v263_v7  ;;  %247 = vmatprep.mubr.msk.bf16.mxu1 %vm264_vm1, %v263_v7 }
   0x3   :  { %232 = vmatpush3.bf16.msra.mxu0 %v253_v6  ;;  %v255_v9 = vld [vmem:[%s335_s3] sm:$0xff]   ;;  %v256_v10 = vld [vmem:[%s335_s3 + $0x8] sm:$0xff]   ;;  %v258_v27 = vld [vmem:[%s335_s3 + $0x18] sm:$0xff]  }
   0x4   :  { %v27_v4 = vsel %vm26_vm0, %v24_v2, 0.0  ;;  %v30_v5 = vsel %vm26_vm0, %v25_v3, 0.0  ;;  %233 = vmatprep.subr.bf16.mxu0 %v263_v7  ;;  %240 = vmatpush3.bf16.msra.mxu1 %v255_v9  ;;  %v214_v20 = vld [vmem:[%s336_s1] ss:$0 sm:$0xff] }
   0x5   :  { %28 = vadd.xlane.f32.xlu0 %v27_v4  ;;  %241 = vmatprep.subr.bf16.mxu1 %v263_v7 }
   0x7   :  { %234 = vmatpush3.bf16.msra.mxu0 %v254_v8 }
   0x8   :  { %242 = vmatpush3.bf16.msra.mxu1 %v256_v10 }
   0x9   :  { %31 = vadd.xlane.f32.xlu0 %v30_v5  ;;  %243 = vmatprep.subr.bf16.mxu1 %v263_v7  ;;  %v120_v35 = vld [vmem:[#allocation2] sm:$0xff]  ;;  %v121_v37 = vld [vmem:[#allocation2 + $0x8] sm:$0xff] }
   0xc   :  { %244 = vmatpush3.bf16.msra.mxu1 %v257_v26 }
   0xd   :  { %245 = vmatprep.subr.bf16.mxu1 %v263_v7 }
  0x10   :  { %246 = vmatpush3.bf16.msra.mxu1 %v258_v27 }
  0x92   :  { %v29_v11 = vpop.xlane.xlu0 %28 }
  0x93   :  { %v34_v12 = vmul.f32 0.03125, %v29_v11 }
  0x95   :  { %v36_v13 = vadd.f32 1e-06, %v34_v12 }
  0x96   :  { %v32_v14 = vpop.xlane.xlu0 %31 }
  0x97   :  { %259 = vrsqrt.f32 %v36_v13  ;;  %v35_v15 = vmul.f32 0.03125, %v32_v14 }
  0x99   :  { %v37_v16 = vadd.f32 1e-06, %v35_v15 }
  0x9b   :  { %261 = vrsqrt.f32 %v37_v16 }
  0xa1   :  { %v260_v17 = vpop.eup %259 }
  0xa2   :  { %v40_v18 = vmul.f32 %v260_v17, %v22_v0 }
  0xa4   :  { %v49_v22 = vmul.f32 %v214_v20, %v40_v18 }
  0xa5   :  { %v262_v19 = vpop.eup %261 }
  0xa6   :  { %v41_v21 = vmul.f32 %v262_v19, %v23_v1 }
  0xa8   :  { %v50_v23 = vmul.f32 %v214_v20, %v41_v21 }
  0xaa   :  { %v51_v24 = vpack.c.bf16 %v50_v23, %v49_v22 }
  0xac   :  { %52 = vst.msk [vmem:[#allocation3] sm:$0xff] %vm26_vm0, %v51_v24 }
  0xb3   :  { %v55_v25 = vld [vmem:[#allocation3] sm:$0xff] }
  0xb4   :  { %236 = vmatmul.mubr.msk.bf16.vlgmr.msra.gmra.mrb[0].mxu0 %vm26_vm0, %v55_v25 }
 0x187   :  { %v110_v28 = vpop.f32.mrb[0].mxu0 }
 0x188   :  { %v237_v29 = vpop.f32.mrb[1].mxu0  ;;  %v117_v31 = vmax.f32 %v110_v28, 0.0 }
 0x189   :  { %v113_v30 = vpop.f32.mrb[2].mxu0 }
 0x18a   :  { %v118_v32 = vmax.f32 %v113_v30, 0.0  ;;  %v238_v33 = vpop.f32.mrb[3].mxu0 }
 0x18c   :  { %v119_v34 = vpack.c.bf16 %v118_v32, %v117_v31 }
 0x18e   :  { %248 = vmatmul.mubr.msk.bf16.vlgmr.msra.gmra.mrb[0].mxu1 %vm154_vm2, %v119_v34 }
 0x261   :  { %v192_v36 = vpop.f32.mrb[0].mxu1 }
 0x262   :  { %v199_v38 = vadd.f32 %v192_v36, %v120_v35  ;;  %v249_v39 = vpop.f32.mrb[1].mxu1 }
 0x263   :  { %v195_v40 = vpop.f32.mrb[2].mxu1 }
 0x264   :  { %201 = vst.msk [vmem:[#allocation2] sm:$0xff] %vm26_vm0, %v199_v38  ;;  %v200_v41 = vadd.f32 %v195_v40, %v121_v37  ;;  %v250_v42 = vpop.f32.mrb[3].mxu1 }
 0x266   :  { %202 = vst.msk [vmem:[#allocation2 + $0x8] sm:$0xff] %vm26_vm0, %v200_v41 }
 0x26b   :  { %v206_v43 = vld [vmem:[#allocation2] sm:$0xff] }
 0x26c   :  { %208 = vst.msk [vmem:[%s337_s4] sm:$0xff] %vm26_vm0, %v206_v43 }
 0x26d   :  { %v207_v44 = vld [vmem:[#allocation2 + $0x8] sm:$0xff] }
 0x26e   :  { %209 = vst.msk [vmem:[%s337_s4 + $0x8] sm:$0xff] %vm26_vm0, %v207_v44 }

</bundles_post_ra>
